<compile_context>
chip_gen: v5e
topology: v5e:2x2
jax: 0.10.0
libtpu: 0.0.40
codegen_flags: <defaults>
</compile_context>

<pallas_src>
import functools

import jax
import jax.numpy as jnp
from jax import lax
from jax.experimental import pallas as pl
from jax.experimental.pallas import tpu as pltpu


_VMEM_LIMIT_BYTES = 48 * 1024 * 1024        # safe on v7x (64 MiB physical) and v5e/v6e
_TARGET_BLOCK_BYTES = 8 * 1024 * 1024       # ~8 MiB (f32) streamed per grid step
_MAX_HT = 256 * 128                         # bound the unrolled lane-chunk loop
_RESIDENT_MAX_F32_BYTES = 4 * 1024 * 1024   # fused single-kernel path threshold


def _round_up(x, m):
    return (x + m - 1) // m * m


def _choose_tiles(rows, hw, target_bytes):
    """Pick (row_tile, hw_tile) for the streaming passes.

    row_tile is a multiple of 8 (or == rows); hw_tile is a multiple of 128
    (or == hw).  Blocks are sized off the f32 compute footprint so VMEM use is
    dtype-independent.  We keep >= 2 row tiles whenever possible (both v7x
    TensorCores get work in the stats pass) and cap the row tile at 128 so the
    lane-dense accumulators of the streaming stats loop stay vreg-resident.
    """
    r_up = _round_up(rows, 8)
    half_cap = max(8, _round_up(r_up // 2, 8)) if r_up >= 16 else 8
    rt = min(r_up, min(128, half_cap))

    ht = max((target_bytes // (rt * 4)) // 128 * 128, 128)
    ht = min(ht, _MAX_HT)
    if ht >= hw:
        ht = hw                                   # full extent -> no ragged HW tail
        # Rebalance: grow the row tile back toward the byte budget (still a
        # multiple of 8 and still leaving >= 2 row tiles when rows allow it).
        rt_budget = max((target_bytes // (max(hw, 1) * 4)) // 8 * 8, 8)
        rt = min(max(rt, min(rt_budget, half_cap)), r_up)
    if rt >= rows:
        rt = rows                                 # full extent
    return rt, ht


# ---------------------------------------------------------------------------
# Streaming pass 1: per-row sum and sum-of-squares (HW = trailing reduction).
# ---------------------------------------------------------------------------
def _stats_kernel(x_ref, sum_ref, sumsq_ref, acc_s_ref, acc_q_ref, *, hw, ht, n_hw):
    k = pl.program_id(1)

    if n_hw == 1:
        # Single full-extent spatial block: reduce directly (one XLU pass).
        xv = x_ref[...].astype(jnp.float32)                  # (rt, hw)
        sum_ref[...] = jnp.sum(xv, axis=1, keepdims=True)
        sumsq_ref[...] = jnp.sum(xv * xv, axis=1, keepdims=True)
        return

    @pl.when(k == 0)
    def _():
        acc_s_ref[...] = jnp.zeros_like(acc_s_ref)
        acc_q_ref[...] = jnp.zeros_like(acc_q_ref)

    ragged = (hw % ht) != 0
    if ragged:
        # Hoisted once per step (JAX does not CSE broadcast_in_dim in loops).
        lane = lax.broadcasted_iota(jnp.int32, (x_ref.shape[0], 128), 1)
        rem = hw - k * ht                                    # valid lanes in this block

    # Lane-dense accumulation: per-128-lane chunk loads + VALU adds only; the
    # cross-lane (XLU) reduce and width-1 store run once at the last HW step.
    ps = None
    pq = None
    for c in range(ht // 128):
        v = x_ref[:, c * 128:(c + 1) * 128].astype(jnp.float32)
        if ragged:
            v = jnp.where(lane < rem - c * 128, v, 0.0)      # mask OOB tail lanes
        ps = v if ps is None else ps + v
        pq = v * v if pq is None else pq + v * v
    acc_s_ref[...] += ps
    acc_q_ref[...] += pq

    @pl.when(k == n_hw - 1)
    def _():
        sum_ref[...] = jnp.sum(acc_s_ref[...], axis=1, keepdims=True)
        sumsq_ref[...] = jnp.sum(acc_q_ref[...], axis=1, keepdims=True)


# ---------------------------------------------------------------------------
# Streaming pass 2: channel-wise rescale, fully parallel 2-D grid.
# ---------------------------------------------------------------------------
def _rescale_kernel(x_ref, sc_ref, o_ref):
    if o_ref.dtype == jnp.bfloat16:
        # bf16 VALU path (v6e/v7x); still correct (just a lower-precision mul)
        # on v5e where Mosaic upcasts internally.
        o_ref[...] = x_ref[...] * sc_ref[...].astype(jnp.bfloat16)
    else:
        o_ref[...] = (x_ref[...].astype(jnp.float32) * sc_ref[...]).astype(o_ref.dtype)


# ---------------------------------------------------------------------------
# Fully VMEM-resident fused path: stats + conv_du + rescale in one kernel.
# ---------------------------------------------------------------------------
def _fused_cca_kernel(x_ref, w1t_ref, b1_ref, w2t_ref, b2_ref, o_ref, *, inv_hw):
    xv = x_ref[...].astype(jnp.float32)                      # (B, C, HW)
    s = jnp.sum(xv, axis=2)                                  # (B, C)
    sq = jnp.sum(xv * xv, axis=2)
    mean = s * inv_hw
    var = jnp.maximum(sq * inv_hw - mean * mean, 0.0)        # one-pass variance
    y = jnp.sqrt(var) + mean                                 # contrast + avg_pool
    y1 = jnp.dot(y, w1t_ref[...], preferred_element_type=jnp.float32) + b1_ref[...]
    y1 = jnp.maximum(y1, 0.0)                                # ReLU
    y2 = jnp.dot(y1, w2t_ref[...], preferred_element_type=jnp.float32) + b2_ref[...]
    sc = jax.nn.sigmoid(y2)                                  # (B, C)
    o_ref[...] = (xv * sc[:, :, None]).astype(o_ref.dtype)


def cca_layer(x, w1, b1, w2, b2, *,
              target_block_bytes=_TARGET_BLOCK_BYTES,
              resident_max_bytes=_RESIDENT_MAX_F32_BYTES):
    """Contrast-channel attention (CCALayer.forward).

    x : (B, C, H, W)     any float dtype (compute in f32)
    w1: (Cr, C)  b1: (Cr,)   -- Conv2d(C, Cr, 1) weights
    w2: (C, Cr)  b2: (C,)    -- Conv2d(Cr, C, 1) weights
    """
    B, C, H, W = x.shape
    Cr = w1.shape[0]
    HW = H * W
    rows = B * C
    inv_hw = 1.0 / float(HW)

    w1t = w1.T.astype(jnp.float32)                 # (C, Cr) pre-transposed on host
    w2t = w2.T.astype(jnp.float32)                 # (Cr, C)
    b1r = b1.reshape(1, Cr).astype(jnp.float32)
    b2r = b2.reshape(1, C).astype(jnp.float32)

    # ---- fused VMEM-resident path: x read once, written once ---------------
    if rows * HW * 4 <= resident_max_bytes:
        x3 = x.reshape(B, C, HW)
        out3 = pl.pallas_call(
            functools.partial(_fused_cca_kernel, inv_hw=inv_hw),
            out_shape=jax.ShapeDtypeStruct((B, C, HW), x.dtype),
            grid_spec=pltpu.PrefetchScalarGridSpec(
                num_scalar_prefetch=0,
                grid=(1,),
                in_specs=[pl.BlockSpec((B, C, HW), lambda i: (0, 0, 0)),
                          pl.BlockSpec((C, Cr), lambda i: (0, 0)),
                          pl.BlockSpec((1, Cr), lambda i: (0, 0)),
                          pl.BlockSpec((Cr, C), lambda i: (0, 0)),
                          pl.BlockSpec((1, C), lambda i: (0, 0))],
                out_specs=pl.BlockSpec((B, C, HW), lambda i: (0, 0, 0)),
            ),
            compiler_params=pltpu.CompilerParams(
                vmem_limit_bytes=_VMEM_LIMIT_BYTES),
        )(x3, w1t, b1r, w2t, b2r)
        return out3.reshape(B, C, H, W)

    # ---- streaming two-pass path (no padded copies, no output slice) -------
    rt, ht = _choose_tiles(rows, HW, target_block_bytes)
    n_row = pl.cdiv(rows, rt)
    n_hw = pl.cdiv(HW, ht)

    x2 = x.reshape(rows, HW)                       # free reshape; x is never copied

    sums, sumsqs = pl.pallas_call(
        functools.partial(_stats_kernel, hw=HW, ht=ht, n_hw=int(n_hw)),
        out_shape=(jax.ShapeDtypeStruct((rows, 1), jnp.float32),
                   jax.ShapeDtypeStruct((rows, 1), jnp.float32)),
        grid_spec=pltpu.PrefetchScalarGridSpec(
            num_scalar_prefetch=0,
            grid=(n_row, n_hw),
            in_specs=[pl.BlockSpec((rt, ht), lambda i, k: (i, k))],
            out_specs=(pl.BlockSpec((rt, 1), lambda i, k: (i, 0)),
                       pl.BlockSpec((rt, 1), lambda i, k: (i, 0))),
            scratch_shapes=[pltpu.VMEM((rt, 128), jnp.float32),
                            pltpu.VMEM((rt, 128), jnp.float32)],
        ),
        compiler_params=pltpu.CompilerParams(
            dimension_semantics=("parallel", "arbitrary"),
            vmem_limit_bytes=_VMEM_LIMIT_BYTES),
    )(x2)

    # conv_du on the (B, C) stats: tiny, let XLA fuse it (no extra Mosaic launch).
    s = sums.reshape(B, C)
    sq = sumsqs.reshape(B, C)
    mean = s * inv_hw
    # One-pass (biased, as in stdv_channels) variance, clamped >= 0.
    # TODO(synk): switch to a two-level sum-of-squared-deviations if inputs with
    # |mean| >> std ever make this cancellation a precision problem.
    var = jnp.maximum(sq * inv_hw - mean * mean, 0.0)
    y = jnp.sqrt(var) + mean                                 # contrast + avg_pool
    y1 = jnp.maximum(jnp.dot(y, w1t) + b1r, 0.0)
    scales = jax.nn.sigmoid(jnp.dot(y1, w2t) + b2r)          # (B, C) f32
    sc_rows = scales.reshape(rows, 1)

    out2 = pl.pallas_call(
        _rescale_kernel,
        out_shape=jax.ShapeDtypeStruct((rows, HW), x.dtype),
        grid_spec=pltpu.PrefetchScalarGridSpec(
            num_scalar_prefetch=0,
            grid=(n_row, n_hw),
            in_specs=[pl.BlockSpec((rt, ht), lambda i, k: (i, k)),
                      pl.BlockSpec((rt, 1), lambda i, k: (i, 0))],
            out_specs=pl.BlockSpec((rt, ht), lambda i, k: (i, k)),
        ),
        compiler_params=pltpu.CompilerParams(
            dimension_semantics=("parallel", "parallel"),
            vmem_limit_bytes=_VMEM_LIMIT_BYTES),
    )(x2, sc_rows)

    return out2.reshape(B, C, H, W)


def cca_reference(x, w1, b1, w2, b2):
    # Pure-JAX reference of the PyTorch CCALayer forward.
    B, C, H, W = x.shape
    mean = jnp.mean(x, axis=(2, 3), keepdims=True)
    var = jnp.mean((x - mean) ** 2, axis=(2, 3), keepdims=True)
    y = jnp.sqrt(var) + mean                                 # (B, C, 1, 1)
    yv = y.reshape(B, C)
    y1 = jnp.maximum(yv @ w1.T + b1.reshape(1, -1), 0.0)
    y2 = jax.nn.sigmoid(y1 @ w2.T + b2.reshape(1, -1))
    return x * y2.reshape(B, C, 1, 1)


if __name__ == "__main__":
    def make_case(key, B, C, H, W, reduction):
        Cr = max(C // reduction, 1)
        kx, k1, k2, k3, k4 = jax.random.split(key, 5)
        x = jax.random.normal(kx, (B, C, H, W), dtype=jnp.float32)
        # Conv2d(C, Cr, 1): weight (Cr, C, 1, 1) -> (Cr, C), bias (Cr,)
        w1 = jax.random.normal(k1, (Cr, C), dtype=jnp.float32) * 0.1
        b1 = jax.random.normal(k2, (Cr,), dtype=jnp.float32) * 0.1
        # Conv2d(Cr, C, 1): weight (C, Cr, 1, 1) -> (C, Cr), bias (C,)
        w2 = jax.random.normal(k3, (C, Cr), dtype=jnp.float32) * 0.1
        b2 = jax.random.normal(k4, (C,), dtype=jnp.float32) * 0.1
        return x, w1, b1, w2, b2

    key = jax.random.PRNGKey(0)
    ka, kb = jax.random.split(key)

    # Case 1: CCALayer(channel=64, reduction=16) as used inside IMDB
    # (distilled_feats * 4 = 64).  Small feature map -> fused resident path.
    args1 = make_case(ka, 2, 64, 16, 16, 16)
    out1 = jax.block_until_ready(jax.jit(cca_layer)(*args1))
    ref1 = cca_reference(*args1)
    assert out1.shape == args1[0].shape
    assert jnp.allclose(out1, ref1, atol=1e-5, rtol=1e-5)

    # Case 2: force the streaming two-pass path with ragged HW / row tiles
    # (exercises tail-lane masking in the stats pass and dropped OOB writes in
    # the rescale pass).
    args2 = make_case(kb, 1, 40, 19, 23, 8)       # rows=40, HW=437
    run2 = jax.jit(functools.partial(cca_layer,
                                     target_block_bytes=32 * 1024,
                                     resident_max_bytes=0))
    out2 = jax.block_until_ready(run2(*args2))
    ref2 = cca_reference(*args2)
    assert out2.shape == args2[0].shape
    assert jnp.allclose(out2, ref2, atol=1e-5, rtol=1e-5)

    print("KERNEL_OK")
</pallas_src>

<mosaic_0001>
module attributes {stable_mosaic.version = 11 : i64} {
  func.func @_fused_cca_kernel(%arg0: i32, %arg1: memref<2x64x256xf32, #tpu.memory_space<vmem>>, %arg2: memref<64x4xf32, #tpu.memory_space<vmem>>, %arg3: memref<1x4xf32, #tpu.memory_space<vmem>>, %arg4: memref<4x64xf32, #tpu.memory_space<vmem>>, %arg5: memref<1x64xf32, #tpu.memory_space<vmem>>, %arg6: memref<2x64x256xf32, #tpu.memory_space<vmem>>) attributes {dimension_semantics = [#tpu.dimension_semantics<arbitrary>], iteration_bounds = array<i64: 1>, scalar_prefetch = 0 : i64, scratch_operands = 0 : i64, tpu.core_type = #tpu.core_type<tc>, window_params = [{pipeline_mode = #tpu.pipeline_mode<synchronous>, transform_indices = @transform_0, window_bounds = array<i64: 2, 64, 256>}, {pipeline_mode = #tpu.pipeline_mode<synchronous>, transform_indices = @transform_1, window_bounds = array<i64: 64, 4>}, {pipeline_mode = #tpu.pipeline_mode<synchronous>, transform_indices = @transform_2, window_bounds = array<i64: 1, 4>}, {pipeline_mode = #tpu.pipeline_mode<synchronous>, transform_indices = @transform_3, window_bounds = array<i64: 4, 64>}, {pipeline_mode = #tpu.pipeline_mode<synchronous>, transform_indices = @transform_4, window_bounds = array<i64: 1, 64>}, {pipeline_mode = #tpu.pipeline_mode<synchronous>, transform_indices = @transform_5, window_bounds = array<i64: 2, 64, 256>}]} {
    %c0 = arith.constant 0 : index
    %c0_0 = arith.constant 0 : index
    %c0_1 = arith.constant 0 : index
    %0 = vector.load %arg1[%c0, %c0_0, %c0_1] : memref<2x64x256xf32, #tpu.memory_space<vmem>>, vector<2x64x256xf32>
    %cst = arith.constant dense<0.000000e+00> : vector<2x64xf32>
    %1 = vector.multi_reduction <add>, %0, %cst [2] : vector<2x64x256xf32> to vector<2x64xf32>
    %2 = arith.mulf %0, %0 : vector<2x64x256xf32>
    %cst_2 = arith.constant dense<0.000000e+00> : vector<2x64xf32>
    %3 = vector.multi_reduction <add>, %2, %cst_2 [2] : vector<2x64x256xf32> to vector<2x64xf32>
    %cst_3 = arith.constant 3.906250e-03 : f32
    %4 = vector.broadcast %cst_3 : f32 to vector<2x64xf32>
    %5 = arith.mulf %1, %4 : vector<2x64xf32>
    %cst_4 = arith.constant 3.906250e-03 : f32
    %6 = vector.broadcast %cst_4 : f32 to vector<2x64xf32>
    %7 = arith.mulf %3, %6 : vector<2x64xf32>
    %8 = arith.mulf %5, %5 : vector<2x64xf32>
    %9 = arith.subf %7, %8 : vector<2x64xf32>
    %cst_5 = arith.constant 0.000000e+00 : f32
    %10 = vector.broadcast %cst_5 : f32 to vector<2x64xf32>
    %11 = arith.maximumf %9, %10 : vector<2x64xf32>
    %12 = math.sqrt %11 : vector<2x64xf32>
    %13 = arith.addf %12, %5 : vector<2x64xf32>
    %c0_6 = arith.constant 0 : index
    %c0_7 = arith.constant 0 : index
    %14 = vector.load %arg2[%c0_6, %c0_7] : memref<64x4xf32, #tpu.memory_space<vmem>>, vector<64x4xf32>
    %cst_8 = arith.constant dense<0.000000e+00> : vector<2x4xf32>
    %15 = tpu.matmul %13, %14, %cst_8 {dimension_numbers = #tpu.dot_dimension_numbers<[1], [0], [0], [1], [0, 0, 1, 1], [], []>} : vector<2x64xf32>, vector<64x4xf32>, vector<2x4xf32> -> vector<2x4xf32>
    %c0_9 = arith.constant 0 : index
    %c0_10 = arith.constant 0 : index
    %16 = vector.load %arg3[%c0_9, %c0_10] : memref<1x4xf32, #tpu.memory_space<vmem>>, vector<1x4xf32>
    %17 = vector.broadcast %16 : vector<1x4xf32> to vector<2x4xf32>
    %18 = arith.addf %15, %17 : vector<2x4xf32>
    %cst_11 = arith.constant 0.000000e+00 : f32
    %19 = vector.broadcast %cst_11 : f32 to vector<2x4xf32>
    %20 = arith.maximumf %18, %19 : vector<2x4xf32>
    %c0_12 = arith.constant 0 : index
    %c0_13 = arith.constant 0 : index
    %21 = vector.load %arg4[%c0_12, %c0_13] : memref<4x64xf32, #tpu.memory_space<vmem>>, vector<4x64xf32>
    %cst_14 = arith.constant dense<0.000000e+00> : vector<2x64xf32>
    %22 = tpu.matmul %20, %21, %cst_14 {dimension_numbers = #tpu.dot_dimension_numbers<[1], [0], [0], [1], [0, 0, 1, 1], [], []>} : vector<2x4xf32>, vector<4x64xf32>, vector<2x64xf32> -> vector<2x64xf32>
    %c0_15 = arith.constant 0 : index
    %c0_16 = arith.constant 0 : index
    %23 = vector.load %arg5[%c0_15, %c0_16] : memref<1x64xf32, #tpu.memory_space<vmem>>, vector<1x64xf32>
    %24 = vector.broadcast %23 : vector<1x64xf32> to vector<2x64xf32>
    %25 = arith.addf %22, %24 : vector<2x64xf32>
    %26 = arith.negf %25 : vector<2x64xf32>
    %27 = math.exp %26 : vector<2x64xf32>
    %cst_17 = arith.constant 1.000000e+00 : f32
    %28 = vector.broadcast %cst_17 : f32 to vector<2x64xf32>
    %29 = arith.addf %28, %27 : vector<2x64xf32>
    %30 = arith.divf %28, %29 : vector<2x64xf32>
    %31 = vector.shape_cast %30 : vector<2x64xf32> to vector<2x64x1xf32>
    %32 = vector.broadcast %31 : vector<2x64x1xf32> to vector<2x64x256xf32>
    %33 = arith.mulf %0, %32 : vector<2x64x256xf32>
    %c0_18 = arith.constant 0 : index
    %c0_19 = arith.constant 0 : index
    %c0_20 = arith.constant 0 : index
    %34 = vector.load %arg6[%c0_18, %c0_19, %c0_20] : memref<2x64x256xf32, #tpu.memory_space<vmem>>, vector<2x64x256xf32>
    tpu.vector_store %arg6[%c0_18, %c0_19, %c0_20], %33 {strides = array<i32>} : memref<2x64x256xf32, #tpu.memory_space<vmem>>, vector<2x64x256xf32>,
    return
  }
  func.func @transform_0(%arg0: i32) -> (i32, i32, i32) {
    %c0_i32 = arith.constant 0 : i32
    %c0_i32_0 = arith.constant 0 : i32
    %c0_i32_1 = arith.constant 0 : i32
    %c0_i32_2 = arith.constant 0 : i32
    return %c0_i32, %c0_i32_0, %c0_i32_1 : i32, i32, i32
  }
  func.func @transform_1(%arg0: i32) -> (i32, i32) {
    %c0_i32 = arith.constant 0 : i32
    %c0_i32_0 = arith.constant 0 : i32
    %c0_i32_1 = arith.constant 0 : i32
    return %c0_i32, %c0_i32_0 : i32, i32
  }
  func.func @transform_2(%arg0: i32) -> (i32, i32) {
    %c0_i32 = arith.constant 0 : i32
    %c0_i32_0 = arith.constant 0 : i32
    %c0_i32_1 = arith.constant 0 : i32
    return %c0_i32, %c0_i32_0 : i32, i32
  }
  func.func @transform_3(%arg0: i32) -> (i32, i32) {
    %c0_i32 = arith.constant 0 : i32
    %c0_i32_0 = arith.constant 0 : i32
    %c0_i32_1 = arith.constant 0 : i32
    return %c0_i32, %c0_i32_0 : i32, i32
  }
  func.func @transform_4(%arg0: i32) -> (i32, i32) {
    %c0_i32 = arith.constant 0 : i32
    %c0_i32_0 = arith.constant 0 : i32
    %c0_i32_1 = arith.constant 0 : i32
    return %c0_i32, %c0_i32_0 : i32, i32
  }
  func.func @transform_5(%arg0: i32) -> (i32, i32, i32) {
    %c0_i32 = arith.constant 0 : i32
    %c0_i32_0 = arith.constant 0 : i32
    %c0_i32_1 = arith.constant 0 : i32
    %c0_i32_2 = arith.constant 0 : i32
    return %c0_i32, %c0_i32_0, %c0_i32_1 : i32, i32, i32
  }
}

</mosaic_0001>

<bundles_post_ra>
// kernel: cca_layer.1
= control target key start
LH: loop header
LB: loop body
LE: loop exit
PB: predicated region body
PF: predicated region fallthrough
CT: control target
= control target key end

     0   :  { %vm501_vm7 = vcmask 130112   ;;  %vm505_vm11 = vcmask 195712   ;;  %s1628_s0 = inlined_call_operand.vmem [shape: f32[2,64,256], index: 0, kind: input, shape index: {}]   ;;  %s1629_s2 = inlined_call_operand.vmem [shape: f32[1,4], index: 2, kind: input, shape index: {}]   ;;  %s1630_s1 = inlined_call_operand.vmem [shape: f32[64,4], index: 1, kind: input, shape index: {}]   ;;  %s1631_s4 = inlined_call_operand.vmem [shape: f32[1,64], index: 4, kind: input, shape index: {}]   ;;  %s1632_s3 = inlined_call_operand.vmem [shape: f32[4,64], index: 3, kind: input, shape index: {}]   ;;  %s1633_s5 = inlined_call_operand.vmem [shape: f32[2,64,256], index: 5, kind: output, shape index: {}]  }
   0x1   :  { %v36_v0 = vld [vmem:[%s1628_s0 + $0x80] sm:$0xff]  ;;  %v37_v1 = vld [vmem:[%s1628_s0 + $0x88] sm:$0xff]  ;;  %v38_v9 = vld [vmem:[%s1628_s0 + $0x90] sm:$0xff] }
   0x2   :  { %v24_v2 = vld [vmem:[%s1628_s0 + $0x20] sm:$0xff]  ;;  %v76_v3 = vadd.f32 %v37_v1, %v36_v0  ;;  %v25_v4 = vld [vmem:[%s1628_s0 + $0x28] sm:$0xff]  ;;  %v39_v10 = vld [vmem:[%s1628_s0 + $0x98] sm:$0xff]  ;;  %v116_v27 = vmul.f32 %v36_v0, %v36_v0  ;;  %v117_v28 = vmul.f32 %v37_v1, %v37_v1  ;;  %v118_v29 = vmul.f32 %v38_v9, %v38_v9 }
   0x3   :  { %v20_v5 = vld [vmem:[%s1628_s0] sm:$0xff]  ;;  %v21_v6 = vld [vmem:[%s1628_s0 + $0x8] sm:$0xff]  ;;  %v58_v7 = vadd.f32 %v25_v4, %v24_v2  ;;  %v22_v13 = vld [vmem:[%s1628_s0 + $0x10] sm:$0xff]  ;;  %v79_v15 = vadd.f32 %v39_v10, %v38_v9  ;;  %v119_v30 = vmul.f32 %v39_v10, %v39_v10  ;;  %v104_v38 = vmul.f32 %v24_v2, %v24_v2 }
   0x4   :  { %v52_v8 = vadd.f32 %v21_v6, %v20_v5  ;;  %77 = vadd.xlane.f32.xlu1 %v76_v3  ;;  %v40_v11 = vld [vmem:[%s1628_s0 + $0xa0] sm:$0xff]  ;;  %v41_v12 = vld [vmem:[%s1628_s0 + $0xa8] sm:$0xff]  ;;  %v23_v14 = vld [vmem:[%s1628_s0 + $0x18] sm:$0xff]  ;;  %v100_v20 = vmul.f32 %v20_v5, %v20_v5  ;;  %v101_v21 = vmul.f32 %v21_v6, %v21_v6  ;;  %v102_v31 = vmul.f32 %v22_v13, %v22_v13 }
   0x5   :  { %59 = vadd.xlane.f32.xlu2 %v58_v7  ;;  %v82_v16 = vadd.f32 %v41_v12, %v40_v11  ;;  %v55_v17 = vadd.f32 %v23_v14, %v22_v13  ;;  %v42_v18 = vld [vmem:[%s1628_s0 + $0xb0] sm:$0xff]  ;;  %v43_v19 = vld [vmem:[%s1628_s0 + $0xb8] sm:$0xff]  ;;  %v103_v32 = vmul.f32 %v23_v14, %v23_v14  ;;  %v156_v33 = vadd.f32 %v117_v28, %v116_v27  ;;  %v44_v36 = vld [vmem:[%s1628_s0 + $0xc0] sm:$0xff] }
   0x6   :  { %53 = vadd.xlane.f32.xlu0 %v52_v8  ;;  %v26_v22 = vld [vmem:[%s1628_s0 + $0x30] sm:$0xff]  ;;  %v27_v23 = vld [vmem:[%s1628_s0 + $0x38] sm:$0xff]  ;;  %v85_v24 = vadd.f32 %v43_v19, %v42_v18  ;;  %v132_v25 = vadd.f32 %v101_v21, %v100_v20  ;;  %v159_v34 = vadd.f32 %v119_v30, %v118_v29  ;;  %v45_v37 = vld [vmem:[%s1628_s0 + $0xc8] sm:$0xff]  ;;  %v105_v39 = vmul.f32 %v25_v4, %v25_v4 }
   0x7   :  { %v61_v26 = vadd.f32 %v27_v23, %v26_v22  ;;  %v135_v35 = vadd.f32 %v103_v32, %v102_v31  ;;  %v28_v40 = vld [vmem:[%s1628_s0 + $0x40] sm:$0xff]  ;;  %v29_v41 = vld [vmem:[%s1628_s0 + $0x48] sm:$0xff]  ;;  %v88_v42 = vadd.f32 %v45_v37, %v44_v36  ;;  %v30_v45 = vld [vmem:[%s1628_s0 + $0x50] sm:$0xff]  ;;  %v120_v47 = vmul.f32 %v40_v11, %v40_v11 }
   0x8   :  { %v138_v43 = vadd.f32 %v105_v39, %v104_v38  ;;  %v64_v44 = vadd.f32 %v29_v41, %v28_v40  ;;  %v31_v46 = vld [vmem:[%s1628_s0 + $0x58] sm:$0xff]  ;;  %v121_v48 = vmul.f32 %v41_v12, %v41_v12  ;;  %v46_v49 = vld [vmem:[%s1628_s0 + $0xd0] sm:$0xff]  ;;  %v122_v54 = vmul.f32 %v42_v18, %v42_v18  ;;  %v32_v58 = vld [vmem:[%s1628_s0 + $0x60] sm:$0xff] }
   0x9   :  { %v47_v50 = vld [vmem:[%s1628_s0 + $0xd8] sm:$0xff]  ;;  %v67_v51 = vadd.f32 %v31_v46, %v30_v45  ;;  %v123_v55 = vmul.f32 %v43_v19, %v43_v19  ;;  %v106_v56 = vmul.f32 %v26_v22, %v26_v22  ;;  %v107_v57 = vmul.f32 %v27_v23, %v27_v23  ;;  %v33_v59 = vld [vmem:[%s1628_s0 + $0x68] sm:$0xff]  ;;  %v48_v3 = vld [vmem:[%s1628_s0 + $0xe0] sm:$0xff] }
   0xa   :  { %v91_v52 = vadd.f32 %v47_v50, %v46_v49  ;;  %v162_v53 = vadd.f32 %v121_v48, %v120_v47  ;;  %v70_v61 = vadd.f32 %v33_v59, %v32_v58  ;;  %v108_v63 = vmul.f32 %v28_v40, %v28_v40  ;;  %v49_v4 = vld [vmem:[%s1628_s0 + $0xe8] sm:$0xff]  ;;  %v50_v8 = vld [vmem:[%s1628_s0 + $0xf0] sm:$0xff]  ;;  %v51_v9 = vld [vmem:[%s1628_s0 + $0xf8] sm:$0xff] }
   0xb   :  { %v165_v60 = vadd.f32 %v123_v55, %v122_v54  ;;  %v141_v62 = vadd.f32 %v107_v57, %v106_v56  ;;  %v109_v0 = vmul.f32 %v29_v41, %v29_v41  ;;  %v124_v1 = vmul.f32 %v44_v36, %v44_v36  ;;  %v34_v12 = vld [vmem:[%s1628_s0 + $0x70] sm:$0xff]  ;;  %v35_v13 = vld [vmem:[%s1628_s0 + $0x78] sm:$0xff] }
   0xc   :  { %80 = vadd.xlane.f32.xlu1 %v79_v15  ;;  %v125_v2 = vmul.f32 %v45_v37, %v45_v37  ;;  %v94_v7 = vadd.f32 %v49_v4, %v48_v3  ;;  %v110_v10 = vmul.f32 %v30_v45, %v30_v45  ;;  %v111_v11 = vmul.f32 %v31_v46, %v31_v46 }
   0xd   :  { %83 = vadd.xlane.f32.xlu2 %v82_v16  ;;  %v144_v5 = vadd.f32 %v109_v0, %v108_v63  ;;  %v97_v14 = vadd.f32 %v51_v9, %v50_v8  ;;  %v73_v16 = vadd.f32 %v35_v13, %v34_v12  ;;  %v113_v18 = vmul.f32 %v33_v59, %v33_v59 }
   0xe   :  { %56 = vadd.xlane.f32.xlu0 %v55_v17  ;;  %v168_v6 = vadd.f32 %v125_v2, %v124_v1  ;;  %v147_v15 = vadd.f32 %v111_v11, %v110_v10  ;;  %v112_v17 = vmul.f32 %v32_v58, %v32_v58  ;;  %v128_v19 = vmul.f32 %v48_v3, %v48_v3 }
   0xf   :  { %v129_v20 = vmul.f32 %v49_v4, %v49_v4  ;;  %v126_v21 = vmul.f32 %v46_v49, %v46_v49  ;;  %v127_v22 = vmul.f32 %v47_v50, %v47_v50  ;;  %v131_v27 = vmul.f32 %v51_v9, %v51_v9 }
  0x10   :  { %v150_v23 = vadd.f32 %v113_v18, %v112_v17  ;;  %v114_v28 = vmul.f32 %v34_v12, %v34_v12  ;;  %v115_v29 = vmul.f32 %v35_v13, %v35_v13 }
  0x12   :  { %v153_v31 = vadd.f32 %v115_v29, %v114_v28  ;;  %v496_v29 = vlaneseq }
  0x14   :  { %86 = vadd.xlane.f32.xlu1 %v85_v24  ;;  %v174_v24 = vadd.f32 %v129_v20, %v128_v19 }
  0x15   :  { %133 = vadd.xlane.f32.xlu2 %v132_v25  ;;  %v171_v25 = vadd.f32 %v127_v22, %v126_v21 }
  0x16   :  { %62 = vadd.xlane.f32.xlu0 %v61_v26  ;;  %v130_v26 = vmul.f32 %v50_v8, %v50_v8 }
  0x18   :  { %v177_v30 = vadd.f32 %v131_v27, %v130_v26 }
  0x1c   :  { %157 = vadd.xlane.f32.xlu1 %v156_v33 }
  0x1d   :  { %160 = vadd.xlane.f32.xlu2 %v159_v34 }
  0x1e   :  { %136 = vadd.xlane.f32.xlu0 %v135_v35 }
  0x24   :  { %89 = vadd.xlane.f32.xlu1 %v88_v42 }
  0x25   :  { %139 = vadd.xlane.f32.xlu2 %v138_v43 }
  0x26   :  { %65 = vadd.xlane.f32.xlu0 %v64_v44 }
  0x2c   :  { %68 = vadd.xlane.f32.xlu1 %v67_v51 }
  0x2d   :  { %92 = vadd.xlane.f32.xlu2 %v91_v52 }
  0x2e   :  { %163 = vadd.xlane.f32.xlu0 %v162_v53 }
  0x34   :  { %166 = vadd.xlane.f32.xlu1 %v165_v60 }
  0x35   :  { %71 = vadd.xlane.f32.xlu2 %v70_v61 }
  0x36   :  { %142 = vadd.xlane.f32.xlu0 %v141_v62 }
  0x3c   :  { %145 = vadd.xlane.f32.xlu1 %v144_v5 }
  0x3d   :  { %169 = vadd.xlane.f32.xlu2 %v168_v6 }
  0x3e   :  { %95 = vadd.xlane.f32.xlu0 %v94_v7 }
  0x44   :  { %98 = vadd.xlane.f32.xlu1 %v97_v14 }
  0x45   :  { %148 = vadd.xlane.f32.xlu2 %v147_v15 }
  0x46   :  { %74 = vadd.xlane.f32.xlu0 %v73_v16 }
  0x4c   :  { %151 = vadd.xlane.f32.xlu1 %v150_v23 }
  0x4d   :  { %175 = vadd.xlane.f32.xlu2 %v174_v24 }
  0x4e   :  { %172 = vadd.xlane.f32.xlu0 %v171_v25 }
  0x54   :  { %178 = vadd.xlane.f32.xlu1 %v177_v30 }
  0x56   :  { %154 = vadd.xlane.f32.xlu0 %v153_v31 }
  0x77   :  { %v78_v32 = vpop.xlane.xlu1 %77 }
  0x78   :  { %v60_v33 = vpop.xlane.xlu2 %59  ;;  %v1007_v45 = vmul.f32 0.00390625, %v78_v32 }
  0x79   :  { %v54_v34 = vpop.xlane.xlu0 %53  ;;  %v1024_v63 = vmul.f32 0.00390625, %v60_v33 }
  0x7a   :  { %v1003_v38 = vmul.f32 0.00390625, %v54_v34  ;;  %v220_v50 = vmul.f32 %v1007_v45, %v1007_v45 }
  0x7b   :  { %v214_v7 = vmul.f32 %v1024_v63, %v1024_v63 }
  0x7c   :  { %v212_v42 = vmul.f32 %v1003_v38, %v1003_v38 }
  0x7f   :  { %v81_v35 = vpop.xlane.xlu1 %80 }
  0x80   :  { %v84_v36 = vpop.xlane.xlu2 %83  ;;  %v1009_v46 = vmul.f32 0.00390625, %v81_v35 }
  0x81   :  { %v57_v37 = vpop.xlane.xlu0 %56  ;;  %v1042_v12 = vmul.f32 0.00390625, %v84_v36 }
  0x82   :  { %v1011_v47 = vmul.f32 0.00390625, %v57_v37  ;;  %v221_v54 = vmul.f32 %v1009_v46, %v1009_v46 }
  0x83   :  { %v222_v22 = vmul.f32 %v1042_v12, %v1042_v12 }
  0x84   :  { %v213_v55 = vmul.f32 %v1011_v47, %v1011_v47 }
  0x87   :  { %v87_v39 = vpop.xlane.xlu1 %86 }
  0x88   :  { %v134_v40 = vpop.xlane.xlu2 %133  ;;  %v1058_v23 = vmul.f32 0.00390625, %v87_v39 }
  0x89   :  { %v63_v41 = vpop.xlane.xlu0 %62  ;;  %v196_v43 = vmul.f32 0.00390625, %v134_v40 }
  0x8a   :  { %v1062_v26 = vmul.f32 0.00390625, %v63_v41  ;;  %v223_v35 = vmul.f32 %v1058_v23, %v1058_v23  ;;  %v1074_v41 = vand.u32 127, %v496_v29 }
  0x8b   :  { %v228_v44 = vsub.f32 %v196_v43, %v212_v42 }
  0x8c   :  { %v215_v37 = vmul.f32 %v1062_v26, %v1062_v26 }
  0x8d   :  { %v1013_v48 = vmax.f32 %v228_v44, 0.0 }
  0x8f   :  { %809 = vrsqrt.f32 %v1013_v48  ;;  %v158_v49 = vpop.xlane.xlu1 %157  ;;  %vm267_vm0 = vcmp.eq.f32.partialorder %v1013_v48, inf  ;;  %v270_v42 = vand.u32 2147483648, %v1013_v48  ;;  %vm269_vm1 = vcmp.eq.f32.partialorder %v1013_v48, 0.0 }
  0x90   :  { %v204_v51 = vmul.f32 0.00390625, %v158_v49  ;;  %v161_v52 = vpop.xlane.xlu2 %160 }
  0x91   :  { %v137_v53 = vpop.xlane.xlu0 %136  ;;  %v205_v56 = vmul.f32 0.00390625, %v161_v52 }
  0x92   :  { %v197_v57 = vmul.f32 0.00390625, %v137_v53  ;;  %v236_v58 = vsub.f32 %v204_v51, %v220_v50 }
  0x93   :  { %v237_v59 = vsub.f32 %v205_v56, %v221_v54 }
  0x94   :  { %v229_v60 = vsub.f32 %v197_v57, %v213_v55  ;;  %v1022_v61 = vmax.f32 %v236_v58, 0.0 }
  0x95   :  { %v810_v62 = vpop.eup %809  ;;  %v1026_v0 = vmax.f32 %v237_v59, 0.0 }
  0x96   :  { %v1028_v1 = vmax.f32 %v229_v60, 0.0  ;;  %v261_v2 = vmul.f32 %v810_v62, %v1013_v48  ;;  %811 = vrsqrt.f32 %v1022_v61  ;;  %v366_v53 = vand.u32 2147483648, %v1022_v61 }
  0x97   :  { %813 = vrsqrt.f32 %v1026_v0  ;;  %v1033_v3 = vpop.xlane.xlu1 %89  ;;  %vm363_vm4 = vcmp.eq.f32.partialorder %v1022_v61, inf  ;;  %vm375_vm5 = vcmp.eq.f32.partialorder %v1026_v0, inf  ;;  %vm365_vm9 = vcmp.eq.f32.partialorder %v1022_v61, 0.0 }
  0x98   :  { %v262_v4 = vmul.f32 %v810_v62, %v261_v2  ;;  %815 = vrsqrt.f32 %v1028_v1  ;;  %v140_v5 = vpop.xlane.xlu2 %139  ;;  %vm279_vm2 = vcmp.eq.f32.partialorder %v1028_v1, inf  ;;  %v282_v59 = vand.u32 2147483648, %v1028_v1 }
  0x99   :  { %v1036_v6 = vpop.xlane.xlu0 %65  ;;  %v198_v8 = vmul.f32 0.00390625, %v140_v5  ;;  %vm281_vm3 = vcmp.eq.f32.partialorder %v1028_v1, 0.0  ;;  %vm377_vm10 = vcmp.eq.f32.partialorder %v1026_v0, 0.0 }
  0x9a   :  { %v263_v9 = vmul.f32 0.5, %v262_v4 }
  0x9b   :  { %v230_v10 = vsub.f32 %v198_v8, %v214_v7 }
  0x9c   :  { %v1040_v11 = vpop.eup %811  ;;  %v264_v13 = vsub.f32 1.5, %v263_v9 }
  0x9d   :  { %v1044_v14 = vpop.eup %813  ;;  %v1046_v15 = vmax.f32 %v230_v10, 0.0  ;;  %v357_v17 = vmul.f32 %v1040_v11, %v1022_v61 }
  0x9e   :  { %v816_v16 = vpop.eup %815  ;;  %v265_v18 = vmul.f32 %v810_v62, %v264_v13  ;;  %v369_v19 = vmul.f32 %v1044_v14, %v1026_v0 }
  0x9f   :  { %v273_v20 = vmul.f32 %v816_v16, %v1028_v1  ;;  %817 = vrsqrt.f32 %v1046_v15  ;;  %v1054_v21 = vpop.xlane.xlu1 %68  ;;  %v358_v30 = vmul.f32 %v1040_v11, %v357_v17  ;;  %vm291_vm6 = vcmp.eq.f32.partialorder %v1046_v15, inf }
  0xa0   :  { %v1060_v24 = vpop.xlane.xlu2 %92  ;;  %v266_v31 = vmul.f32 %v265_v18, %v1013_v48  ;;  %v370_v32 = vmul.f32 %v1044_v14, %v369_v19  ;;  %v1098_v18 = vmul.f32 0.00390625, %v1033_v3  ;;  %vm293_vm8 = vcmp.eq.f32.partialorder %v1046_v15, 0.0 }
  0xa1   :  { %v164_v25 = vpop.xlane.xlu0 %163  ;;  %v274_v27 = vmul.f32 %v816_v16, %v273_v20  ;;  %v359_v43 = vmul.f32 0.5, %v358_v30  ;;  %v474_v30 = vld [vmem:[%s1630_s1 + $0x30] sm:$0xff] }
  0xa2   :  { %v206_v28 = vmul.f32 0.00390625, %v164_v25  ;;  %v371_v49 = vmul.f32 0.5, %v370_v32  ;;  %v268_v52 = vsel %vm267_vm0, %v1013_v48, %v266_v31  ;;  %v1091_v48 = vmul.f32 0.00390625, %v1036_v6 }
  0xa3   :  { %v275_v33 = vmul.f32 0.5, %v274_v27  ;;  %v271_v4 = vsel %vm269_vm1, %v270_v42, %v268_v52  ;;  %v360_v5 = vsub.f32 1.5, %v359_v43  ;;  %v294_v52 = vand.u32 2147483648, %v1046_v15 }
  0xa4   :  { %v238_v34 = vsub.f32 %v206_v28, %v222_v22  ;;  %v372_v7 = vsub.f32 1.5, %v371_v49  ;;  %v452_v20 = vadd.f32 %v271_v4, %v1003_v38  ;;  %v1104_v22 = vadd.s32 4294967288, %v1074_v41  ;;  %v475_v28 = vld [vmem:[%s1630_s1 + $0x38] sm:$0xff] }
  0xa5   :  { %v818_v36 = vpop.eup %817  ;;  %v276_v39 = vsub.f32 1.5, %v275_v33  ;;  %v361_v3 = vmul.f32 %v1040_v11, %v360_v5  ;;  %555 = vmatpush.msra.mxu0 %v475_v28  ;;  %v471_v4 = vld [vmem:[%s1630_s1 + $0x18] sm:$0xff] }
  0xa6   :  { %v1071_v40 = vmax.f32 %v238_v34, 0.0  ;;  %v285_v44 = vmul.f32 %v818_v36, %v1046_v15  ;;  %v373_v27 = vmul.f32 %v1044_v14, %v372_v7  ;;  %v224_v34 = vmul.f32 %v1098_v18, %v1098_v18 }
  0xa7   :  { %v277_v50 = vmul.f32 %v816_v16, %v276_v39  ;;  %v167_v51 = vpop.xlane.xlu1 %166  ;;  %556 = vmatpush.msra.mxu0 %v474_v30  ;;  %v498_v42 = vperm.slane %v452_v20, %v1074_v41  ;;  %v1159_v7 = vmul.f32 0.00390625, %v1060_v24  ;;  %v470_v24 = vld [vmem:[%s1630_s1 + $0x10] sm:$0xff]  ;;  %v469_v30 = vld [vmem:[%s1630_s1 + $0x8] sm:$0xff] }
  0xa8   :  { %819 = vrsqrt.f32 %v1071_v40  ;;  %v286_v54 = vmul.f32 %v818_v36, %v285_v44  ;;  %v207_v55 = vmul.f32 0.00390625, %v167_v51  ;;  %v1082_v56 = vpop.xlane.xlu2 %71  ;;  %v362_v44 = vmul.f32 %v361_v3, %v1022_v61  ;;  %v472_v51 = vld [vmem:[%s1630_s1 + $0x20] sm:$0xff] }
  0xa9   :  { %v143_v57 = vpop.xlane.xlu0 %142  ;;  %v278_v58 = vmul.f32 %v277_v50, %v1028_v1  ;;  %v374_v49 = vmul.f32 %v373_v27, %v1026_v0  ;;  %v378_v27 = vand.u32 2147483648, %v1026_v0  ;;  %vm387_vm12 = vcmp.eq.f32.partialorder %v1071_v40, inf }
  0xaa   :  { %v199_v60 = vmul.f32 0.00390625, %v143_v57  ;;  %v287_v62 = vmul.f32 0.5, %v286_v54  ;;  %v239_v2 = vsub.f32 %v207_v55, %v223_v35  ;;  %vm389_vm13 = vcmp.eq.f32.partialorder %v1071_v40, 0.0 }
  0xab   :  { %v280_v9 = vsel %vm279_vm2, %v1028_v1, %v278_v58 }
  0xac   :  { %v231_v8 = vsub.f32 %v199_v60, %v215_v37  ;;  %v288_v10 = vsub.f32 1.5, %v287_v62  ;;  %v1093_v13 = vmax.f32 %v239_v2, 0.0  ;;  %v283_v16 = vsel %vm281_vm3, %v282_v59, %v280_v9 }
  0xad   :  { %v453_v25 = vadd.f32 %v283_v16, %v1011_v47  ;;  %v216_v47 = vmul.f32 %v1091_v48, %v1091_v48  ;;  %v1149_v60 = vmul.f32 0.00390625, %v1054_v21  ;;  %v1165_v21 = vadd.s32 4294967280, %v1074_v41 }
  0xae   :  { %v1095_v17 = vpop.eup %819  ;;  %v1100_v19 = vmax.f32 %v231_v8, 0.0  ;;  %v289_v1 = vmul.f32 %v818_v36, %v288_v10  ;;  %821 = vrsqrt.f32 %v1093_v13  ;;  %v473_v36 = vld [vmem:[%s1630_s1 + $0x28] sm:$0xff]  ;;  %v1168_v8 = vmul.f32 0.00390625, %v1082_v56 }
  0xaf   :  { %v381_v6 = vmul.f32 %v1095_v17, %v1071_v40  ;;  %v146_v38 = vpop.xlane.xlu1 %145  ;;  %v500_v43 = vperm.slane %v453_v25, %v1104_v22  ;;  %557 = vmatpush.msra.mxu0 %v473_v36  ;;  %v364_v10 = vsel %vm363_vm4, %v1022_v61, %v362_v44  ;;  %v376_v16 = vsel %vm375_vm5, %v1026_v0, %v374_v49 }
  0xb0   :  { %823 = vrsqrt.f32 %v1100_v19  ;;  %v290_v31 = vmul.f32 %v289_v1, %v1046_v15  ;;  %v200_v14 = vmul.f32 0.00390625, %v146_v38  ;;  %v170_v32 = vpop.xlane.xlu2 %169  ;;  %v217_v38 = vmul.f32 %v1149_v60, %v1149_v60 }
  0xb1   :  { %v382_v11 = vmul.f32 %v1095_v17, %v381_v6  ;;  %v96_v33 = vpop.xlane.xlu0 %95  ;;  %v208_v35 = vmul.f32 0.00390625, %v170_v32  ;;  %v502_v58 = vsel %vm501_vm7, %v500_v43, %v498_v42  ;;  %558 = vmatpush.msra.mxu0 %v472_v51  ;;  %v367_v32 = vsel %vm365_vm9, %v366_v53, %v364_v10 }
  0xb2   :  { %v232_v37 = vsub.f32 %v200_v14, %v216_v47  ;;  %v292_v39 = vsel %vm291_vm6, %v1046_v15, %v290_v31  ;;  %v225_v31 = vmul.f32 %v1159_v7, %v1159_v7  ;;  %v468_v14 = vld [vmem:[%s1630_s1] sm:$0xff]  ;;  %v218_v0 = vmul.f32 %v1168_v8, %v1168_v8 }
  0xb3   :  { %v240_v50 = vsub.f32 %v208_v35, %v224_v34  ;;  %v383_v55 = vmul.f32 0.5, %v382_v11  ;;  %v295_v5 = vsel %vm293_vm8, %v294_v52, %v292_v39  ;;  %559 = vmatpush.msra.mxu0 %v471_v4  ;;  %v379_v34 = vsel %vm377_vm10, %v378_v27, %v376_v16 }
  0xb4   :  { %v1140_v54 = vpop.eup %821  ;;  %v1142_v57 = vmax.f32 %v232_v37, 0.0  ;;  %v454_v3 = vadd.f32 %v295_v5, %v1024_v63  ;;  %v1195_v63 = vmul.f32 0.00390625, %v96_v33  ;;  %v390_v43 = vand.u32 2147483648, %v1071_v40 }
  0xb5   :  { %v393_v62 = vmul.f32 %v1140_v54, %v1093_v13  ;;  %v1153_v2 = vmax.f32 %v240_v50, 0.0  ;;  %v384_v20 = vsub.f32 1.5, %v383_v55  ;;  %560 = vmatpush.msra.mxu0 %v470_v24  ;;  %v1220_v44 = vadd.f32 %v367_v32, %v1007_v45 }
  0xb6   :  { %v1146_v59 = vpop.eup %823  ;;  %825 = vrsqrt.f32 %v1142_v57  ;;  %v504_v33 = vperm.slane %v454_v3, %v1165_v21  ;;  %v1223_v49 = vadd.f32 %v379_v34, %v1009_v46  ;;  %v226_v52 = vmul.f32 %v1195_v63, %v1195_v63 }
  0xb7   :  { %v297_v15 = vmul.f32 %v1146_v59, %v1100_v19  ;;  %827 = vrsqrt.f32 %v1153_v2  ;;  %v1171_v9 = vpop.xlane.xlu1 %98  ;;  %v394_v56 = vmul.f32 %v1140_v54, %v393_v62  ;;  %v385_v36 = vmul.f32 %v1095_v17, %v384_v20  ;;  %561 = vmatpush.msra.mxu0 %v469_v30 }
  0xb8   :  { %v149_v6 = vpop.xlane.xlu2 %148  ;;  %v1226_v50 = vsel %vm505_vm11, %v504_v33, %v502_v58  ;;  %v306_v62 = vand.u32 2147483648, %v1100_v19  ;;  %vm303_vm14 = vcmp.eq.f32.partialorder %v1100_v19, inf  ;;  %v1239_v3 = vadd.s32 4294967272, %v1074_v41 }
  0xb9   :  { %v298_v1 = vmul.f32 %v1146_v59, %v297_v15  ;;  %v75_v25 = vpop.xlane.xlu0 %74  ;;  %v201_v28 = vmul.f32 0.00390625, %v149_v6  ;;  %v395_v37 = vmul.f32 0.5, %v394_v56  ;;  %562 = vmatpush.msra.mxu0 %v468_v14  ;;  %v386_v4 = vmul.f32 %v385_v36, %v1071_v40 }
  0xba   :  { %v1242_v27 = vmul.f32 0.00390625, %v1171_v9  ;;  %vm305_vm15 = vcmp.eq.f32.partialorder %v1100_v19, 0.0  ;;  %vm399_vm0 = vcmp.eq.f32.partialorder %v1093_v13, inf  ;;  %vm315_vm1 = vcmp.eq.f32.partialorder %v1142_v57, inf }
  0xbb   :  { %v299_v47 = vmul.f32 0.5, %v298_v1  ;;  %v233_v11 = vsub.f32 %v201_v28, %v217_v38  ;;  %v396_v45 = vsub.f32 1.5, %v395_v37  ;;  %v402_v1 = vand.u32 2147483648, %v1093_v13 }
  0xbc   :  { %v1203_v35 = vpop.eup %825  ;;  %v1244_v38 = vmul.f32 0.00390625, %v75_v25  ;;  %v318_v37 = vand.u32 2147483648, %v1142_v57  ;;  %vm401_vm2 = vcmp.eq.f32.partialorder %v1093_v13, 0.0  ;;  %vm317_vm3 = vcmp.eq.f32.partialorder %v1142_v57, 0.0 }
  0xbd   :  { %v1209_v39 = vpop.eup %827  ;;  %v300_v42 = vsub.f32 1.5, %v299_v47  ;;  %v309_v61 = vmul.f32 %v1203_v35, %v1142_v57  ;;  %v1213_v53 = vmax.f32 %v233_v11, 0.0  ;;  %v388_v11 = vsel %vm387_vm12, %v1071_v40, %v386_v4 }
  0xbe   :  { %v405_v17 = vmul.f32 %v1209_v39, %v1153_v2  ;;  %v397_v14 = vmul.f32 %v1140_v54, %v396_v45  ;;  %v227_v54 = vmul.f32 %v1242_v27, %v1242_v27  ;;  %v219_v33 = vmul.f32 %v1244_v38, %v1244_v38 }
  0xbf   :  { %v310_v51 = vmul.f32 %v1203_v35, %v309_v61  ;;  %829 = vrsqrt.f32 %v1213_v53  ;;  %v152_v55 = vpop.xlane.xlu1 %151  ;;  %v301_v16 = vmul.f32 %v1146_v59, %v300_v42  ;;  %v391_v61 = vsel %vm389_vm13, %v390_v43, %v388_v11 }
  0xc0   :  { %v406_v5 = vmul.f32 %v1209_v39, %v405_v17  ;;  %v202_v46 = vmul.f32 0.00390625, %v152_v55  ;;  %v176_v15 = vpop.xlane.xlu2 %175  ;;  %vm411_vm4 = vcmp.eq.f32.partialorder %v1153_v2, inf  ;;  %vm413_vm5 = vcmp.eq.f32.partialorder %v1153_v2, 0.0 }
  0xc1   :  { %v173_v24 = vpop.xlane.xlu0 %172  ;;  %v210_v58 = vmul.f32 0.00390625, %v176_v15  ;;  %v311_v20 = vmul.f32 0.5, %v310_v51  ;;  %v414_v15 = vand.u32 2147483648, %v1153_v2  ;;  %vm327_vm6 = vcmp.eq.f32.partialorder %v1213_v53, inf }
  0xc2   :  { %v209_v10 = vmul.f32 0.00390625, %v173_v24  ;;  %v234_v56 = vsub.f32 %v202_v46, %v218_v0  ;;  %v407_v6 = vmul.f32 0.5, %v406_v5  ;;  %v527_v0 = vperm.slane %v1220_v44, %v1074_v41 }
  0xc3   :  { %v242_v28 = vsub.f32 %v210_v58, %v226_v52  ;;  %v312_v59 = vsub.f32 1.5, %v311_v20  ;;  %v398_v5 = vmul.f32 %v397_v14, %v1093_v13  ;;  %v1288_v58 = vadd.s32 4294967264, %v1074_v41 }
  0xc4   :  { %v241_v30 = vsub.f32 %v209_v10, %v225_v31  ;;  %v1247_v47 = vmax.f32 %v234_v56, 0.0  ;;  %v302_v31 = vmul.f32 %v301_v16, %v1100_v19  ;;  %v408_v34 = vsub.f32 1.5, %v407_v6 }
  0xc5   :  { %v830_v32 = vpop.eup %829  ;;  %v1254_v9 = vmax.f32 %v242_v28, 0.0  ;;  %v313_v52 = vmul.f32 %v1203_v35, %v312_v59  ;;  %v1285_v35 = vadd.f32 %v391_v61, %v1042_v12  ;;  %v400_v59 = vsel %vm399_vm0, %v1093_v13, %v398_v5 }
  0xc6   :  { %v1256_v25 = vmax.f32 %v241_v30, 0.0  ;;  %v321_v36 = vmul.f32 %v830_v32, %v1213_v53  ;;  %831 = vrsqrt.f32 %v1247_v47  ;;  %v304_v45 = vsel %vm303_vm14, %v1100_v19, %v302_v31 }
  0xc7   :  { %833 = vrsqrt.f32 %v1254_v9  ;;  %v179_v42 = vpop.xlane.xlu1 %178  ;;  %v409_v46 = vmul.f32 %v1209_v39, %v408_v34  ;;  %v528_v39 = vperm.slane %v1223_v49, %v1104_v22  ;;  %v307_v20 = vsel %vm305_vm15, %v306_v62, %v304_v45 }
  0xc8   :  { %835 = vrsqrt.f32 %v1256_v25  ;;  %v211_v17 = vmul.f32 0.00390625, %v179_v42  ;;  %v322_v55 = vmul.f32 %v830_v32, %v321_v36  ;;  %v314_v56 = vmul.f32 %v313_v52, %v1142_v57 }
  0xc9   :  { %v155_v51 = vpop.xlane.xlu0 %154  ;;  %v410_v11 = vmul.f32 %v409_v46, %v1153_v2  ;;  %v330_v62 = vand.u32 2147483648, %v1213_v53  ;;  %vm329_vm8 = vcmp.eq.f32.partialorder %v1213_v53, 0.0  ;;  %v1324_v61 = vadd.f32 %v307_v20, %v1062_v26 }
  0xca   :  { %v203_v4 = vmul.f32 0.00390625, %v155_v51  ;;  %v243_v40 = vsub.f32 %v211_v17, %v227_v54  ;;  %v323_v43 = vmul.f32 0.5, %v322_v55  ;;  %v1314_v54 = vadd.s32 4294967256, %v1074_v41 }
  0xcb   :  { %v412_v52 = vsel %vm411_vm4, %v1153_v2, %v410_v11  ;;  %vm339_vm9 = vcmp.eq.f32.partialorder %v1247_v47, inf  ;;  %vm423_vm10 = vcmp.eq.f32.partialorder %v1256_v25, inf  ;;  %vm341_vm12 = vcmp.eq.f32.partialorder %v1247_v47, 0.0 }
  0xcc   :  { %v235_v24 = vsub.f32 %v203_v4, %v219_v33  ;;  %v832_v10 = vpop.eup %831  ;;  %v1292_v16 = vmax.f32 %v243_v40, 0.0  ;;  %v324_v6 = vsub.f32 1.5, %v323_v43  ;;  %v316_v33 = vsel %vm315_vm1, %v1142_v57, %v314_v56 }
  0xcd   :  { %v834_v12 = vpop.eup %833  ;;  %v333_v30 = vmul.f32 %v832_v10, %v1247_v47  ;;  %v342_v4 = vand.u32 2147483648, %v1247_v47  ;;  %vm425_vm13 = vcmp.eq.f32.partialorder %v1256_v25, 0.0  ;;  %v426_v5 = vand.u32 2147483648, %v1256_v25 }
  0xce   :  { %v1300_v28 = vmax.f32 %v235_v24, 0.0  ;;  %v836_v14 = vpop.eup %835  ;;  %837 = vrsqrt.f32 %v1292_v16  ;;  %v325_v19 = vmul.f32 %v830_v32, %v324_v6  ;;  %v429_v31 = vmul.f32 %v834_v12, %v1254_v9 }
  0xcf   :  { %v417_v34 = vmul.f32 %v836_v14, %v1256_v25  ;;  %v334_v36 = vmul.f32 %v832_v10, %v333_v30  ;;  %v403_v32 = vsel %vm401_vm2, %v402_v1, %v400_v59  ;;  %v319_v1 = vsel %vm317_vm3, %v318_v37, %v316_v33 }
  0xd0   :  { %839 = vrsqrt.f32 %v1300_v28  ;;  %v430_v42 = vmul.f32 %v834_v12, %v429_v31  ;;  %v326_v17 = vmul.f32 %v325_v19, %v1213_v53  ;;  %v415_v40 = vsel %vm413_vm5, %v414_v15, %v412_v52 }
  0xd1   :  { %v335_v51 = vmul.f32 0.5, %v334_v36  ;;  %v418_v55 = vmul.f32 %v836_v14, %v417_v34  ;;  %vm435_vm14 = vcmp.eq.f32.partialorder %v1254_v9, inf  ;;  %vm437_vm15 = vcmp.eq.f32.partialorder %v1254_v9, 0.0 }
  0xd2   :  { %v431_v13 = vmul.f32 0.5, %v430_v42  ;;  %v328_v57 = vsel %vm327_vm6, %v1213_v53, %v326_v17  ;;  %v438_v2 = vand.u32 2147483648, %v1254_v9  ;;  %v1349_v15 = vadd.f32 %v319_v1, %v1091_v48 }
  0xd3   :  { %v336_v26 = vsub.f32 1.5, %v335_v51  ;;  %v419_v45 = vmul.f32 0.5, %v418_v55  ;;  %vm509_vm0 = vcmask 261312   ;;  %v463_v31 = vadd.f32 %v403_v32, %v1058_v23 }
  0xd4   :  { %v838_v46 = vpop.eup %837  ;;  %v432_v43 = vsub.f32 1.5, %v431_v13  ;;  %vm513_vm1 = vcmask 326912   ;;  %v354_v36 = vand.u32 2147483648, %v1300_v28  ;;  %vm447_vm2 = vcmp.eq.f32.partialorder %v1292_v16, inf }
  0xd5   :  { %v337_v37 = vmul.f32 %v832_v10, %v336_v26  ;;  %v420_v20 = vsub.f32 1.5, %v419_v45  ;;  %v441_v56 = vmul.f32 %v838_v46, %v1292_v16  ;;  %v331_v10 = vsel %vm329_vm8, %v330_v62, %v328_v57 }
  0xd6   :  { %v840_v24 = vpop.eup %839  ;;  %v433_v30 = vmul.f32 %v834_v12, %v432_v43  ;;  %vm351_vm3 = vcmp.eq.f32.partialorder %v1300_v28, inf  ;;  %vm449_vm4 = vcmp.eq.f32.partialorder %v1292_v16, 0.0  ;;  %v450_v53 = vand.u32 2147483648, %v1292_v16 }
  0xd7   :  { %v345_v6 = vmul.f32 %v840_v24, %v1300_v28  ;;  %v338_v59 = vmul.f32 %v337_v37, %v1247_v47  ;;  %v421_v11 = vmul.f32 %v836_v14, %v420_v20  ;;  %v442_v19 = vmul.f32 %v838_v46, %v441_v56 }
  0xd8   :  { %v434_v12 = vmul.f32 %v433_v30, %v1254_v9  ;;  %vm353_vm5 = vcmp.eq.f32.partialorder %v1300_v28, 0.0  ;;  %v464_v32 = vadd.f32 %v415_v40, %v1098_v18  ;;  %v529_v42 = vsel %vm501_vm7, %v528_v39, %v527_v0 }
  0xd9   :  { %v346_v34 = vmul.f32 %v840_v24, %v345_v6  ;;  %v340_v48 = vsel %vm339_vm9, %v1247_v47, %v338_v59  ;;  %v422_v14 = vmul.f32 %v421_v11, %v1256_v25  ;;  %v443_v23 = vmul.f32 0.5, %v442_v19 }
  0xda   :  { %v436_v33 = vsel %vm435_vm14, %v1254_v9, %v434_v12  ;;  %v457_v55 = vadd.f32 %v331_v10, %v1149_v60  ;;  %v343_v18 = vsel %vm341_vm12, %v342_v4, %v340_v48  ;;  %v530_v22 = vperm.slane %v1285_v35, %v1165_v21 }
  0xdb   :  { %v347_v62 = vmul.f32 0.5, %v346_v34  ;;  %v424_v17 = vsel %vm423_vm10, %v1256_v25, %v422_v14  ;;  %v439_v51 = vsel %vm437_vm15, %v438_v2, %v436_v33  ;;  %v444_v52 = vsub.f32 1.5, %v443_v23 }
  0xdc   :  { %v427_v44 = vsel %vm425_vm13, %v426_v5, %v424_v17  ;;  %v508_v9 = vperm.slane %v1324_v61, %v1239_v3  ;;  %v532_v39 = vperm.slane %v463_v31, %v1239_v3  ;;  %v466_v60 = vadd.f32 %v439_v51, %v1195_v63  ;;  %v808_v31 = vld [vmem:[%s1631_s4] ss:$0 sm:$0xff] }
  0xdd   :  { %v348_v13 = vsub.f32 1.5, %v347_v62  ;;  %v445_v49 = vmul.f32 %v838_v46, %v444_v52  ;;  %v465_v0 = vadd.f32 %v427_v44, %v1159_v7  ;;  %v519_v47 = vadd.s32 4294967248, %v1074_v41 }
  0xde   :  { %v534_v4 = vperm.slane %v464_v32, %v1288_v58  ;;  %v458_v26 = vadd.f32 %v343_v18, %v1168_v8  ;;  %v512_v21 = vperm.slane %v1349_v15, %v1288_v58  ;;  %v516_v3 = vperm.slane %v457_v55, %v1314_v54 }
  0xdf   :  { %v349_v1 = vmul.f32 %v840_v24, %v348_v13  ;;  %v446_v25 = vmul.f32 %v445_v49, %v1292_v16  ;;  %v536_v7 = vperm.slane %v465_v0, %v1314_v54  ;;  %vm517_vm7 = vcmask 392512  }
  0xe0   :  { %v531_v63 = vsel %vm505_vm11, %v530_v22, %v529_v42  ;;  %vm521_vm6 = vcmask 458112   ;;  %v523_v45 = vadd.s32 4294967240, %v1074_v41  ;;  %v538_v46 = vperm.slane %v466_v60, %v519_v47  ;;  %v845_v60 = vld [vmem:[%s1628_s0] sm:$0xff] }
  0xe1   :  { %v350_v35 = vmul.f32 %v349_v1, %v1300_v28  ;;  %v448_v61 = vsel %vm447_vm2, %v1292_v16, %v446_v25  ;;  %v533_v8 = vsel %vm509_vm0, %v532_v39, %v531_v63  ;;  %v520_v24 = vperm.slane %v458_v26, %v519_v47 }
  0xe2   :  { %v451_v5 = vsel %vm449_vm4, %v450_v53, %v448_v61  ;;  %v535_v54 = vsel %vm513_vm1, %v534_v4, %v533_v8  ;;  %v510_v37 = vsel %vm509_vm0, %v508_v9, %v1226_v50  ;;  %vm525_vm11 = vcmask 523712   ;;  %v568_v50 = vld [vmem:[%s1632_s3] sm:$0xf]  ;;  %v846_v4 = vld [vmem:[%s1628_s0 + $0x8] sm:$0xff] }
  0xe3   :  { %v352_v58 = vsel %vm351_vm3, %v1300_v28, %v350_v35  ;;  %v467_v43 = vadd.f32 %v451_v5, %v1242_v27  ;;  %v537_v41 = vsel %vm517_vm7, %v536_v7, %v535_v54  ;;  %v514_v16 = vsel %vm513_vm1, %v512_v21, %v510_v37  ;;  %v847_v21 = vld [vmem:[%s1628_s0 + $0x30] sm:$0xff]  ;;  %v848_v35 = vld [vmem:[%s1628_s0 + $0x38] sm:$0xff]  ;;  %v854_v37 = vld [vmem:[%s1628_s0 + $0x48] sm:$0xff] }
  0xe4   :  { %v355_v40 = vsel %vm353_vm5, %v354_v36, %v352_v58  ;;  %v518_v56 = vsel %vm517_vm7, %v516_v3, %v514_v16  ;;  %v539_v28 = vsel %vm521_vm6, %v538_v46, %v537_v41  ;;  %vm542_vm8 = vcmask 1041409   ;;  %v850_v58 = vld [vmem:[%s1628_s0 + $0x28] sm:$0xff]  ;;  %v851_v54 = vld [vmem:[%s1628_s0 + $0x10] sm:$0xff]  ;;  %v853_v41 = vld [vmem:[%s1628_s0 + $0x40] sm:$0xff] }
  0xe5   :  { %v459_v57 = vadd.f32 %v355_v40, %v1244_v38  ;;  %v540_v20 = vperm.slane %v467_v43, %v523_v45  ;;  %v522_v27 = vsel %vm521_vm6, %v520_v24, %v518_v56  ;;  %vm544_vm9 = vcmask 523264   ;;  %v807_v38 = vld [vmem:[%s1629_s2] ss:$0 sm:$0xff]  ;;  %v852_v40 = vld [vmem:[%s1628_s0 + $0x18] sm:$0xff] }
  0xe6   :  { %vm577_vm10 = vcmask 1043456   ;;  %vm573_vm12 = vcmask 31744   ;;  %v622_v10 = vshrl.u32 %v496_v29, 7 }
  0xe7   :  { %v524_v6 = vperm.slane %v459_v57, %v523_v45  ;;  %v541_v30 = vsel %vm525_vm11, %v540_v20, %v539_v28  ;;  %787 = vmatpush.msk.msra.mxu1 %vm577_vm10, %v568_v50  ;;  %v849_v45 = vld [vmem:[%s1628_s0 + $0x20] sm:$0xff]  ;;  %v858_v50 = vld [vmem:[%s1628_s0 + $0x88] sm:$0xff] }
  0xe8   :  { %790 = vset.pattern.permute.xlu2 %v622_v10  ;;  %v635_v12 = vadd.s32 16, %v622_v10  ;;  %v629_v48 = vadd.s32 8, %v622_v10  ;;  %v653_v44 = vadd.s32 40, %v622_v10  ;;  %v641_v22 = vadd.s32 24, %v622_v10 }
  0xe9   :  { %v526_v2 = vsel %vm525_vm11, %v524_v6, %v522_v27  ;;  %v665_v0 = vadd.s32 56, %v622_v10  ;;  %v647_v9 = vadd.s32 32, %v622_v10  ;;  %v659_v39 = vadd.s32 48, %v622_v10  ;;  %v855_v6 = vld [vmem:[%s1628_s0 + $0x50] sm:$0xff]  ;;  %v856_v27 = vld [vmem:[%s1628_s0 + $0x58] sm:$0xff] }
  0xea   :  { %v543_v15 = vsel %vm542_vm8, %v541_v30, %v526_v2  ;;  %792 = vset.pattern.permute.xlu1 %v635_v12  ;;  %791 = vset.pattern.permute.xlu0 %v629_v48  ;;  %v857_v2 = vld [vmem:[%s1628_s0 + $0x80] sm:$0xff] }
  0xeb   :  { %786 = vmatmul.msk.f32.vlgmr.msra.gmra.mxu0 %vm544_vm9, %v543_v15 }
 0x168   :  { %v564_v59 = vpop.f32.mrf.mxu0 }
 0x169   :  { %v565_v11 = vadd.f32 %v807_v38, %v564_v59 }
 0x16b   :  { %v567_v19 = vmax.f32 %v565_v11, 0.0  ;;  %v859_v11 = vld [vmem:[%s1628_s0 + $0x60] sm:$0xff] }
 0x16d   :  { %788 = vmatmul.msk.f32.vlgmr.msra.gmra.mxu1 %vm573_vm12, %v567_v19 }
 0x1ea   :  { %v598_v34 = vpop.f32.mrf.mxu1 }
 0x1eb   :  { %v599_v36 = vadd.f32 %v808_v31, %v598_v34  ;;  %v860_v31 = vld [vmem:[%s1628_s0 + $0x68] sm:$0xff] }
 0x1ed   :  { %v789_v14 = vmul.f32 -1.442695, %v599_v36 }
 0x1ef   :  { %841 = vpow2.f32 %v789_v14  ;;  %v862_v14 = vld [vmem:[%s1628_s0 + $0x78] sm:$0xff] }
 0x1f5   :  { %v842_v23 = vpop.eup %841 }
 0x1f6   :  { %v604_v53 = vadd.f32 1.0, %v842_v23 }
 0x1f8   :  { %843 = vrcp.f32 %v604_v53  ;;  %v616_v42 = vand.u32 2147483648, %v604_v53  ;;  %v614_v51 = vand.u32 2147483647, %v604_v53  ;;  %vm610_vm14 = vweird.f32 %v604_v53 }
 0x1fa   :  { %v617_v52 = vor.u32 1.1754944e-38, %v616_v42  ;;  %vm615_vm0 = vcmp.eq.f32.partialorder %v614_v51, 8.507059e+37 }
 0x1fe   :  { %v844_v62 = vpop.eup %843 }
 0x1ff   :  { %v606_v33 = vmul.f32 %v844_v62, %v604_v53  ;;  %vm611_vm13 = vweird.f32 %v844_v62  ;;  %v863_v53 = vld [vmem:[%s1628_s0 + $0xd0] sm:$0xff] }
 0x200   :  { %vm612_vm15 = vmor %vm610_vm14, %vm611_vm13 }
 0x201   :  { %v607_v32 = vsub.f32 1.0, %v606_v33  ;;  %v864_v33 = vld [vmem:[%s1628_s0 + $0xd8] sm:$0xff] }
 0x203   :  { %v608_v17 = vmul.f32 %v844_v62, %v607_v32 }
 0x205   :  { %v609_v29 = vadd.f32 %v844_v62, %v608_v17  ;;  %v865_v17 = vld [vmem:[%s1628_s0 + $0x90] sm:$0xff] }
 0x207   :  { %v613_v55 = vsel %vm612_vm15, %v844_v62, %v609_v29  ;;  %v866_v29 = vld [vmem:[%s1628_s0 + $0x98] sm:$0xff] }
 0x208   :  { %v618_v18 = vsel %vm615_vm0, %v617_v52, %v613_v55 }
 0x209   :  { %v620_v13 = vperm.slane %v618_v18, 0  ;;  %v669_v49 = vperm.slane %v618_v18, 1  ;;  %v867_v18 = vld [vmem:[%s1628_s0 + $0xa0] sm:$0xff] }
 0x20b   :  { %637 = vperm.xlu1 %792, %v620_v13   ;;  %631 = vperm.xlu0 %791, %v620_v13  }
 0x20c   :  { %625 = vperm.xlu2 %790, %v620_v13  }
 0x213   :  { %795 = vset.pattern.permute.xlu1 %v653_v44  ;;  %798 = vset.pattern.permute.xlu0 %v622_v10 }
 0x214   :  { %793 = vset.pattern.permute.xlu2 %v641_v22 }
 0x21b   :  { %655 = vperm.xlu1 %795, %v620_v13   ;;  %674 = vperm.xlu0 %798, %v669_v49  }
 0x21c   :  { %643 = vperm.xlu2 %793, %v620_v13  }
 0x223   :  { %797 = vset.pattern.permute.xlu1 %v665_v0  ;;  %803 = vset.pattern.permute.xlu0 %v653_v44  ;;  %v868_v44 = vld [vmem:[%s1628_s0 + $0xa8] sm:$0xff] }
 0x224   :  { %794 = vset.pattern.permute.xlu2 %v647_v9 }
 0x22b   :  { %667 = vperm.xlu1 %797, %v620_v13   ;;  %704 = vperm.xlu0 %803, %v669_v49  }
 0x22c   :  { %649 = vperm.xlu2 %794, %v620_v13  }
 0x233   :  { %800 = vset.pattern.permute.xlu1 %v635_v12  ;;  %806 = vset.pattern.permute.xlu0 %v665_v0  ;;  %v861_v12 = vld [vmem:[%s1628_s0 + $0x70] sm:$0xff] }
 0x234   :  { %796 = vset.pattern.permute.xlu2 %v659_v39 }
 0x23b   :  { %686 = vperm.xlu1 %800, %v669_v49  }
 0x23c   :  { %661 = vperm.xlu2 %796, %v620_v13  }
 0x243   :  { %802 = vset.pattern.permute.xlu1 %v647_v9 }
 0x244   :  { %799 = vset.pattern.permute.xlu2 %v629_v48 }
 0x24b   :  { %698 = vperm.xlu1 %802, %v669_v49  }
 0x24c   :  { %680 = vperm.xlu2 %799, %v669_v49  }
 0x253   :  { %805 = vset.pattern.permute.xlu1 %v665_v0  ;;  %v869_v0 = vld [vmem:[%s1628_s0 + $0xb0] sm:$0xff] }
 0x254   :  { %801 = vset.pattern.permute.xlu2 %v641_v22 }
 0x25b   :  { %716 = vperm.xlu1 %805, %v669_v49  }
 0x25c   :  { %692 = vperm.xlu2 %801, %v669_v49  }
 0x264   :  { %804 = vset.pattern.permute.xlu2 %v659_v39  ;;  %v870_v39 = vld [vmem:[%s1628_s0 + $0xb8] sm:$0xff] }
 0x266   :  { %v626_v1 = vpop.permute.xlu2 %625 }
 0x267   :  { %v718_v47 = vmul.f32 %v845_v60, %v626_v1  ;;  %v719_v25 = vmul.f32 %v846_v4, %v626_v1 }
 0x269   :  { %750 = vst [vmem:[%s1633_s5] sm:$0xff] %v718_v47  ;;  %v871_v47 = vld [vmem:[%s1628_s0 + $0xc0] sm:$0xff] }
 0x26a   :  { %751 = vst [vmem:[%s1633_s5 + $0x8] sm:$0xff] %v719_v25  ;;  %v872_v25 = vld [vmem:[%s1628_s0 + $0xc8] sm:$0xff] }
 0x26c   :  { %710 = vperm.xlu2 %804, %v669_v49  }
 0x276   :  { %v644_v26 = vpop.permute.xlu2 %643 }
 0x277   :  { %v724_v7 = vmul.f32 %v847_v21, %v644_v26  ;;  %v725_v3 = vmul.f32 %v848_v35, %v644_v26 }
 0x279   :  { %756 = vst [vmem:[%s1633_s5 + $0x30] sm:$0xff] %v724_v7  ;;  %v873_v7 = vld [vmem:[%s1628_s0 + $0xe0] sm:$0xff] }
 0x27a   :  { %757 = vst [vmem:[%s1633_s5 + $0x38] sm:$0xff] %v725_v3  ;;  %v874_v3 = vld [vmem:[%s1628_s0 + $0xe8] sm:$0xff] }
 0x27d   :  { %v638_v63 = vpop.permute.xlu1 %637  ;;  %v632_v61 = vpop.permute.xlu0 %631 }
 0x27e   :  { %v722_v8 = vmul.f32 %v849_v45, %v638_v63  ;;  %v723_v5 = vmul.f32 %v850_v58, %v638_v63  ;;  %v720_v46 = vmul.f32 %v851_v54, %v632_v61  ;;  %v721_v43 = vmul.f32 %v852_v40, %v632_v61  ;;  %v875_v45 = vld [vmem:[%s1628_s0 + $0xf0] sm:$0xff]  ;;  %v876_v58 = vld [vmem:[%s1628_s0 + $0xf8] sm:$0xff] }
 0x280   :  { %754 = vst [vmem:[%s1633_s5 + $0x20] sm:$0xff] %v722_v8 }
 0x281   :  { %755 = vst [vmem:[%s1633_s5 + $0x28] sm:$0xff] %v723_v5 }
 0x282   :  { %752 = vst [vmem:[%s1633_s5 + $0x10] sm:$0xff] %v720_v46 }
 0x283   :  { %753 = vst [vmem:[%s1633_s5 + $0x18] sm:$0xff] %v721_v43 }
 0x286   :  { %v650_v24 = vpop.permute.xlu2 %649 }
 0x287   :  { %v726_v57 = vmul.f32 %v853_v41, %v650_v24  ;;  %v727_v16 = vmul.f32 %v854_v37, %v650_v24 }
 0x289   :  { %758 = vst [vmem:[%s1633_s5 + $0x40] sm:$0xff] %v726_v57 }
 0x28a   :  { %759 = vst [vmem:[%s1633_s5 + $0x48] sm:$0xff] %v727_v16 }
 0x28d   :  { %v656_v20 = vpop.permute.xlu1 %655  ;;  %v675_v56 = vpop.permute.xlu0 %674 }
 0x28e   :  { %v728_v28 = vmul.f32 %v855_v6, %v656_v20  ;;  %v729_v30 = vmul.f32 %v856_v27, %v656_v20  ;;  %v734_v15 = vmul.f32 %v857_v2, %v675_v56  ;;  %v735_v38 = vmul.f32 %v858_v50, %v675_v56 }
 0x290   :  { %760 = vst [vmem:[%s1633_s5 + $0x50] sm:$0xff] %v728_v28 }
 0x291   :  { %761 = vst [vmem:[%s1633_s5 + $0x58] sm:$0xff] %v729_v30 }
 0x292   :  { %766 = vst [vmem:[%s1633_s5 + $0x80] sm:$0xff] %v734_v15 }
 0x293   :  { %767 = vst [vmem:[%s1633_s5 + $0x88] sm:$0xff] %v735_v38 }
 0x296   :  { %v662_v59 = vpop.permute.xlu2 %661 }
 0x297   :  { %v730_v19 = vmul.f32 %v859_v11, %v662_v59  ;;  %v731_v10 = vmul.f32 %v860_v31, %v662_v59 }
 0x299   :  { %762 = vst [vmem:[%s1633_s5 + $0x60] sm:$0xff] %v730_v19 }
 0x29a   :  { %763 = vst [vmem:[%s1633_s5 + $0x68] sm:$0xff] %v731_v10 }
 0x29d   :  { %v668_v34 = vpop.permute.xlu1 %667  ;;  %v705_v36 = vpop.permute.xlu0 %704 }
 0x29e   :  { %v732_v48 = vmul.f32 %v861_v12, %v668_v34  ;;  %v733_v23 = vmul.f32 %v862_v14, %v668_v34  ;;  %v744_v62 = vmul.f32 %v863_v53, %v705_v36  ;;  %v745_v32 = vmul.f32 %v864_v33, %v705_v36 }
 0x2a0   :  { %764 = vst [vmem:[%s1633_s5 + $0x70] sm:$0xff] %v732_v48 }
 0x2a1   :  { %765 = vst [vmem:[%s1633_s5 + $0x78] sm:$0xff] %v733_v23 }
 0x2a2   :  { %776 = vst [vmem:[%s1633_s5 + $0xd0] sm:$0xff] %v744_v62 }
 0x2a3   :  { %777 = vst [vmem:[%s1633_s5 + $0xd8] sm:$0xff] %v745_v32 }
 0x2a6   :  { %v681_v42 = vpop.permute.xlu2 %680 }
 0x2a7   :  { %v736_v51 = vmul.f32 %v865_v17, %v681_v42  ;;  %v737_v52 = vmul.f32 %v866_v29, %v681_v42 }
 0x2a9   :  { %768 = vst [vmem:[%s1633_s5 + $0x90] sm:$0xff] %v736_v51 }
 0x2aa   :  { %769 = vst [vmem:[%s1633_s5 + $0x98] sm:$0xff] %v737_v52 }
 0x2ad   :  { %v687_v55 = vpop.permute.xlu1 %686 }
 0x2ae   :  { %v738_v13 = vmul.f32 %v867_v18, %v687_v55  ;;  %v739_v22 = vmul.f32 %v868_v44, %v687_v55 }
 0x2b0   :  { %770 = vst [vmem:[%s1633_s5 + $0xa0] sm:$0xff] %v738_v13 }
 0x2b1   :  { %771 = vst [vmem:[%s1633_s5 + $0xa8] sm:$0xff] %v739_v22 }
 0x2b6   :  { %v693_v49 = vpop.permute.xlu2 %692 }
 0x2b7   :  { %v740_v9 = vmul.f32 %v869_v0, %v693_v49  ;;  %v741_v1 = vmul.f32 %v870_v39, %v693_v49 }
 0x2b9   :  { %772 = vst [vmem:[%s1633_s5 + $0xb0] sm:$0xff] %v740_v9 }
 0x2ba   :  { %773 = vst [vmem:[%s1633_s5 + $0xb8] sm:$0xff] %v741_v1 }
 0x2bd   :  { %v699_v60 = vpop.permute.xlu1 %698 }
 0x2be   :  { %v742_v4 = vmul.f32 %v871_v47, %v699_v60  ;;  %v743_v26 = vmul.f32 %v872_v25, %v699_v60 }
 0x2c0   :  { %774 = vst [vmem:[%s1633_s5 + $0xc0] sm:$0xff] %v742_v4 }
 0x2c1   :  { %775 = vst [vmem:[%s1633_s5 + $0xc8] sm:$0xff] %v743_v26 }
 0x2c6   :  { %v711_v21 = vpop.permute.xlu2 %710 }
 0x2c7   :  { %v746_v35 = vmul.f32 %v873_v7, %v711_v21  ;;  %v747_v63 = vmul.f32 %v874_v3, %v711_v21 }
 0x2c9   :  { %778 = vst [vmem:[%s1633_s5 + $0xe0] sm:$0xff] %v746_v35 }
 0x2ca   :  { %779 = vst [vmem:[%s1633_s5 + $0xe8] sm:$0xff] %v747_v63 }
 0x2cd   :  { %v717_v61 = vpop.permute.xlu1 %716 }
 0x2ce   :  { %v748_v8 = vmul.f32 %v875_v45, %v717_v61  ;;  %v749_v5 = vmul.f32 %v876_v58, %v717_v61 }
 0x2d0   :  { %780 = vst [vmem:[%s1633_s5 + $0xf0] sm:$0xff] %v748_v8 }
 0x2d1   :  { %781 = vst [vmem:[%s1633_s5 + $0xf8] sm:$0xff] %v749_v5 }

</bundles_post_ra>
